<compile_context>
chip_gen: v5e
topology: v5e:2x2
jax: 0.10.0
libtpu: 0.0.40
codegen_flags: <defaults>
</compile_context>

<pallas_src>
import jax
import jax.numpy as jnp
from jax.experimental import pallas as pl
from jax.experimental.pallas import tpu as pltpu

NIN = 2
HIDDEN = 32
NOUT = 2 * 200
K = NOUT // NIN            # 200 logits per pixel
DEFAULT_BLOCK_B = 2048     # batch tile (multiple of 8); ~12 MiB VMEM working set


def _round_up(x, m):
    return ((x + m - 1) // m) * m


def made_kernel(x0_ref, w0r_ref, b0_ref, w1o_ref, b1o_ref, b1e_ref,
                o1_ref, o2_ref):
    """One batch tile: x0 (tb,1) -> x1 logits (tb,K), x2 logits (tb,K)."""
    # Normalize exactly like the PyTorch forward: (x - 99.5) / 99.5.
    x0 = (x0_ref[...] - 99.5) * (1.0 / 99.5)                      # (tb, 1)
    # hidden = relu(x0 * w0[0,:] + b0) — mask0 removes the x1 row, so the first
    # masked linear is a broadcast FMA on the VPU (no MXU needed).
    h = jnp.maximum(x0 * w0r_ref[...] + b0_ref[...], 0.0)         # (tb, 32)
    # x2 logits = odd output columns of the second masked linear (mask1 keeps
    # all of them for these 32 hidden units of degree 0).
    o2 = jnp.dot(h, w1o_ref[...],
                 preferred_element_type=jnp.float32) + b1o_ref[...]
    o2_ref[...] = o2.astype(o2_ref.dtype)                         # (tb, K)
    # x1 logits = even output columns, fully masked off -> bias only.  Emitting
    # them here avoids a separate full-size XLA broadcast write to HBM.
    o1_ref[...] = jnp.broadcast_to(b1e_ref[...], o1_ref.shape).astype(o1_ref.dtype)


def two_dimension_made_forward(x, w0, b0, w1, b1, *,
                               block_b=DEFAULT_BLOCK_B,
                               out_dtype=jnp.float32):
    """x: (B, 2) any numeric dtype.  Returns (x1_logits, x2_logits), each (B, K).

    Weights are stored (in_features, out_features): y = x @ W + b (equivalent to
    PyTorch F.linear with W.T).  out_dtype=jnp.bfloat16 halves writeback bytes
    (kernel is write-bound); accumulation stays f32, only the store narrows.
    """
    # Even/odd output split and x0-only dependence are hardcoded for
    # nin=2, hidden=[32], natural ordering (see mask check in __main__).
    assert NIN == 2 and HIDDEN == 32 and NOUT == 2 * K, "MADE mask structure changed"

    B = x.shape[0]
    # Batch tile: multiple of 8; cap so moderate batches still produce >= 2 grid
    # tiles (lets the "parallel" grid axis shard across v7x's two TensorCores).
    tb = min(block_b, _round_up(B, 8))
    if B >= 16:
        tb = min(tb, _round_up(pl.cdiv(B, 2), 8))
    tb = max(8, tb)
    n_tiles = pl.cdiv(B, tb)
    b_pad = n_tiles * tb

    # Only the x0 column ever feeds the network (mask0 zeroes the x1 row).
    x0 = x.astype(jnp.float32)[:, 0:1]                            # (B, 1)
    if b_pad != B:
        x0 = jnp.pad(x0, ((0, b_pad - B), (0, 0)))

    w0_row0 = w0[0:1, :].astype(jnp.float32)                      # (1, 32)
    b0_2d = b0.reshape(1, HIDDEN).astype(jnp.float32)             # (1, 32)
    w1_odd = w1[:, 1::2].astype(jnp.float32)                      # (32, 200)
    b1_odd = b1[1::2].reshape(1, K).astype(jnp.float32)           # (1, 200)
    b1_even = b1[0::2].reshape(1, K).astype(jnp.float32)          # (1, 200)

    # Memory-bound cost hint: dominated by the two (b_pad, K) output writes.
    out_bytes = 2 * b_pad * K * jnp.dtype(out_dtype).itemsize
    in_bytes = b_pad * 4 + (HIDDEN * K + 2 * K + 2 * HIDDEN) * 4
    cost = pl.CostEstimate(
        flops=2 * b_pad * HIDDEN * K + 4 * b_pad * HIDDEN,
        transcendentals=0,
        bytes_accessed=out_bytes + in_bytes)

    out1_p, out2_p = pl.pallas_call(
        made_kernel,
        grid=(n_tiles,),
        in_specs=[
            pl.BlockSpec((tb, 1), lambda i: (i, 0)),          # x0 (batch-tiled)
            pl.BlockSpec((1, HIDDEN), lambda i: (0, 0)),      # w0 row 0 (resident)
            pl.BlockSpec((1, HIDDEN), lambda i: (0, 0)),      # b0
            pl.BlockSpec((HIDDEN, K), lambda i: (0, 0)),      # w1 odd cols
            pl.BlockSpec((1, K), lambda i: (0, 0)),           # b1 odd cols
            pl.BlockSpec((1, K), lambda i: (0, 0)),           # b1 even cols
        ],
        out_specs=(pl.BlockSpec((tb, K), lambda i: (i, 0)),   # x1 logits
                   pl.BlockSpec((tb, K), lambda i: (i, 0))),  # x2 logits
        out_shape=(jax.ShapeDtypeStruct((b_pad, K), out_dtype),
                   jax.ShapeDtypeStruct((b_pad, K), out_dtype)),
        compiler_params=pltpu.CompilerParams(
            dimension_semantics=("parallel",),
            vmem_limit_bytes=32 * 1024 * 1024),
        cost_estimate=cost,
    )(x0, w0_row0, b0_2d, w1_odd, b1_odd, b1_even)

    if b_pad != B:   # no-op (and no copy) when B is a multiple of the tile
        out1_p = out1_p[:B]
        out2_p = out2_p[:B]
    return out1_p, out2_p


def init_params(key):
    """Deterministic nn.Linear-style init: U(-1/sqrt(fan_in), 1/sqrt(fan_in))."""
    k0, k1, k2, k3 = jax.random.split(key, 4)
    bound0 = 1.0 / jnp.sqrt(float(NIN))
    bound1 = 1.0 / jnp.sqrt(float(HIDDEN))
    w0 = jax.random.uniform(k0, (NIN, HIDDEN), jnp.float32, -bound0, bound0)
    b0 = jax.random.uniform(k1, (HIDDEN,), jnp.float32, -bound0, bound0)
    w1 = jax.random.uniform(k2, (HIDDEN, NOUT), jnp.float32, -bound1, bound1)
    b1 = jax.random.uniform(k3, (NOUT,), jnp.float32, -bound1, bound1)
    return w0, b0, w1, b1


if __name__ == "__main__":
    key = jax.random.PRNGKey(0)
    pkey, xkey = jax.random.split(key)
    w0, b0, w1, b1 = init_params(pkey)

    # small batch of integer "pixel" inputs in [0, 200), like the PyTorch sampler
    B = 8
    x = jax.random.randint(xkey, (B, NIN), 0, 200, dtype=jnp.int32)

    x1_logits, x2_logits = two_dimension_made_forward(x, w0, b0, w1, b1)
    jax.block_until_ready((x1_logits, x2_logits))

    # Reference check in plain JAX using the full masked-linear math of the
    # module (MADE masks for nin=2, hidden=[32], natural ordering).  This also
    # validates the hardcoded even/odd output split against the mask structure.
    xf = (x.astype(jnp.float32) - 99.5) / 99.5
    mask0 = jnp.stack([jnp.ones((HIDDEN,)), jnp.zeros((HIDDEN,))], axis=0)   # (2,32)
    mask1 = jnp.broadcast_to((jnp.arange(NOUT) % NIN).astype(jnp.float32)[None, :],
                             (HIDDEN, NOUT))                                  # (32,400)
    h = jnp.maximum(xf @ (w0 * mask0) + b0, 0.0)
    out = h @ (w1 * mask1) + b1
    ref1, ref2 = out[:, 0::2], out[:, 1::2]
    assert x1_logits.shape == (B, K) and x2_logits.shape == (B, K)
    assert jnp.allclose(x1_logits, ref1, atol=1e-5)
    assert jnp.allclose(x2_logits, ref2, atol=1e-5)
    # mask-structure sanity: even output columns truly disconnected from hidden
    assert bool(jnp.all(mask1[:, 0::2] == 0.0)) and bool(jnp.all(mask1[:, 1::2] == 1.0))

    # TODO(synk): sample() (Categorical sampling loop with host-side np.random)
    # is host control flow and is not implemented as a kernel; only the forward
    # pass is kernelized.
    print("KERNEL_OK")
</pallas_src>

<mosaic_0001>
module attributes {stable_mosaic.version = 11 : i64} {
  func.func @made_kernel(%arg0: i32, %arg1: memref<8x1xf32, #tpu.memory_space<vmem>>, %arg2: memref<1x32xf32, #tpu.memory_space<vmem>>, %arg3: memref<1x32xf32, #tpu.memory_space<vmem>>, %arg4: memref<32x200xf32, #tpu.memory_space<vmem>>, %arg5: memref<1x200xf32, #tpu.memory_space<vmem>>, %arg6: memref<1x200xf32, #tpu.memory_space<vmem>>, %arg7: memref<8x200xf32, #tpu.memory_space<vmem>>, %arg8: memref<8x200xf32, #tpu.memory_space<vmem>>) attributes {dimension_semantics = [#tpu.dimension_semantics<parallel>], iteration_bounds = array<i64: 1>, scalar_prefetch = 0 : i64, scratch_operands = 0 : i64, tpu.core_type = #tpu.core_type<tc>, window_params = [{transform_indices = @transform_0, window_bounds = array<i64: 8, 1>}, {pipeline_mode = #tpu.pipeline_mode<synchronous>, transform_indices = @transform_1, window_bounds = array<i64: 1, 32>}, {pipeline_mode = #tpu.pipeline_mode<synchronous>, transform_indices = @transform_2, window_bounds = array<i64: 1, 32>}, {pipeline_mode = #tpu.pipeline_mode<synchronous>, transform_indices = @transform_3, window_bounds = array<i64: 32, 200>}, {pipeline_mode = #tpu.pipeline_mode<synchronous>, transform_indices = @transform_4, window_bounds = array<i64: 1, 200>}, {pipeline_mode = #tpu.pipeline_mode<synchronous>, transform_indices = @transform_5, window_bounds = array<i64: 1, 200>}, {transform_indices = @transform_6, window_bounds = array<i64: 8, 200>}, {transform_indices = @transform_7, window_bounds = array<i64: 8, 200>}]} {
    %c0 = arith.constant 0 : index
    %c0_0 = arith.constant 0 : index
    %0 = vector.load %arg1[%c0, %c0_0] : memref<8x1xf32, #tpu.memory_space<vmem>>, vector<8x1xf32>
    %cst = arith.constant 9.950000e+01 : f32
    %1 = vector.broadcast %cst : f32 to vector<8x1xf32>
    %2 = arith.subf %0, %1 : vector<8x1xf32>
    %cst_1 = arith.constant 0.0100502511 : f32
    %3 = vector.broadcast %cst_1 : f32 to vector<8x1xf32>
    %4 = arith.mulf %2, %3 : vector<8x1xf32>
    %c0_2 = arith.constant 0 : index
    %c0_3 = arith.constant 0 : index
    %5 = vector.load %arg2[%c0_2, %c0_3] : memref<1x32xf32, #tpu.memory_space<vmem>>, vector<1x32xf32>
    %6 = vector.broadcast %4 : vector<8x1xf32> to vector<8x32xf32>
    %7 = vector.broadcast %5 : vector<1x32xf32> to vector<8x32xf32>
    %8 = arith.mulf %6, %7 : vector<8x32xf32>
    %c0_4 = arith.constant 0 : index
    %c0_5 = arith.constant 0 : index
    %9 = vector.load %arg3[%c0_4, %c0_5] : memref<1x32xf32, #tpu.memory_space<vmem>>, vector<1x32xf32>
    %10 = vector.broadcast %9 : vector<1x32xf32> to vector<8x32xf32>
    %11 = arith.addf %8, %10 : vector<8x32xf32>
    %cst_6 = arith.constant 0.000000e+00 : f32
    %12 = vector.broadcast %cst_6 : f32 to vector<8x32xf32>
    %13 = arith.maximumf %11, %12 : vector<8x32xf32>
    %c0_7 = arith.constant 0 : index
    %c0_8 = arith.constant 0 : index
    %14 = vector.load %arg4[%c0_7, %c0_8] : memref<32x200xf32, #tpu.memory_space<vmem>>, vector<32x200xf32>
    %cst_9 = arith.constant dense<0.000000e+00> : vector<8x200xf32>
    %15 = tpu.matmul %13, %14, %cst_9 {dimension_numbers = #tpu.dot_dimension_numbers<[1], [0], [0], [1], [0, 0, 1, 1], [], []>} : vector<8x32xf32>, vector<32x200xf32>, vector<8x200xf32> -> vector<8x200xf32>
    %c0_10 = arith.constant 0 : index
    %c0_11 = arith.constant 0 : index
    %16 = vector.load %arg5[%c0_10, %c0_11] : memref<1x200xf32, #tpu.memory_space<vmem>>, vector<1x200xf32>
    %17 = vector.broadcast %16 : vector<1x200xf32> to vector<8x200xf32>
    %18 = arith.addf %15, %17 : vector<8x200xf32>
    %c0_12 = arith.constant 0 : index
    %c0_13 = arith.constant 0 : index
    %19 = vector.load %arg8[%c0_12, %c0_13] : memref<8x200xf32, #tpu.memory_space<vmem>>, vector<8x200xf32>
    tpu.vector_store %arg8[%c0_12, %c0_13], %18 {strides = array<i32>} : memref<8x200xf32, #tpu.memory_space<vmem>>, vector<8x200xf32>,
    %c0_14 = arith.constant 0 : index
    %c0_15 = arith.constant 0 : index
    %20 = vector.load %arg6[%c0_14, %c0_15] : memref<1x200xf32, #tpu.memory_space<vmem>>, vector<1x200xf32>
    %21 = vector.shape_cast %20 : vector<1x200xf32> to vector<1x200xf32>
    %22 = vector.broadcast %21 : vector<1x200xf32> to vector<8x200xf32>
    %c0_16 = arith.constant 0 : index
    %c0_17 = arith.constant 0 : index
    %23 = vector.load %arg7[%c0_16, %c0_17] : memref<8x200xf32, #tpu.memory_space<vmem>>, vector<8x200xf32>
    tpu.vector_store %arg7[%c0_16, %c0_17], %22 {strides = array<i32>} : memref<8x200xf32, #tpu.memory_space<vmem>>, vector<8x200xf32>,
    return
  }
  func.func @transform_0(%arg0: i32) -> (i32, i32) {
    %c0_i32 = arith.constant 0 : i32
    %c0_i32_0 = arith.constant 0 : i32
    return %arg0, %c0_i32 : i32, i32
  }
  func.func @transform_1(%arg0: i32) -> (i32, i32) {
    %c0_i32 = arith.constant 0 : i32
    %c0_i32_0 = arith.constant 0 : i32
    %c0_i32_1 = arith.constant 0 : i32
    return %c0_i32, %c0_i32_0 : i32, i32
  }
  func.func @transform_2(%arg0: i32) -> (i32, i32) {
    %c0_i32 = arith.constant 0 : i32
    %c0_i32_0 = arith.constant 0 : i32
    %c0_i32_1 = arith.constant 0 : i32
    return %c0_i32, %c0_i32_0 : i32, i32
  }
  func.func @transform_3(%arg0: i32) -> (i32, i32) {
    %c0_i32 = arith.constant 0 : i32
    %c0_i32_0 = arith.constant 0 : i32
    %c0_i32_1 = arith.constant 0 : i32
    return %c0_i32, %c0_i32_0 : i32, i32
  }
  func.func @transform_4(%arg0: i32) -> (i32, i32) {
    %c0_i32 = arith.constant 0 : i32
    %c0_i32_0 = arith.constant 0 : i32
    %c0_i32_1 = arith.constant 0 : i32
    return %c0_i32, %c0_i32_0 : i32, i32
  }
  func.func @transform_5(%arg0: i32) -> (i32, i32) {
    %c0_i32 = arith.constant 0 : i32
    %c0_i32_0 = arith.constant 0 : i32
    %c0_i32_1 = arith.constant 0 : i32
    return %c0_i32, %c0_i32_0 : i32, i32
  }
  func.func @transform_6(%arg0: i32) -> (i32, i32) {
    %c0_i32 = arith.constant 0 : i32
    %c0_i32_0 = arith.constant 0 : i32
    return %arg0, %c0_i32 : i32, i32
  }
  func.func @transform_7(%arg0: i32) -> (i32, i32) {
    %c0_i32 = arith.constant 0 : i32
    %c0_i32_0 = arith.constant 0 : i32
    return %arg0, %c0_i32 : i32, i32
  }
}

</mosaic_0001>

<bundles_post_ra>
// kernel: tpu_custom_call.1
= control target key start
LH: loop header
LB: loop body
LE: loop exit
PB: predicated region body
PF: predicated region fallthrough
CT: control target
= control target key end

     0   :  { %13 = vsyncpa [#allocation3], 0  ;;  %s326_s0 = inlined_call_operand.vmem [shape: f32[8,1], index: 0, kind: input, shape index: {}]   ;;  %s327_s1 = inlined_call_operand.vmem [shape: f32[1,32], index: 1, kind: input, shape index: {}]   ;;  %s328_s2 = inlined_call_operand.vmem [shape: f32[1,32], index: 2, kind: input, shape index: {}]   ;;  %s329_s3 = inlined_call_operand.hbm [shape: f32[32,200], index: 3, kind: input, shape index: {}]   ;;  %s330_s4 = inlined_call_operand.vmem [shape: f32[1,200], index: 4, kind: input, shape index: {}]   ;;  %s331_s5 = inlined_call_operand.vmem [shape: f32[1,200], index: 5, kind: input, shape index: {}]   ;;  %s332_s6 = inlined_call_operand.hbm [shape: f32[8,200], index: 6, kind: output, shape index: {0}]   ;;  %s333_s7 = inlined_call_operand.hbm [shape: f32[8,200], index: 7, kind: output, shape index: {1}]  }
   0x1   :  { %14 = vsyncpa [#allocation4], 0 }
   0x2   :  { %15 = vsyncpa [#allocation7], 0  ;;  %s26_s26 = sshll.u32 %s329_s3, 4  ;;  %s254_s27 = smov [#allocation2]   ;;  %s27_s26 = int_to_ptr.hbm [resolvable:$true] %s26_s26 }
   0x3   :  { %s28_s28 = sshll.u32 %s254_s27, 4  ;;  %s255_s29 = smov 256   ;;  %s29_s28 = int_to_ptr.vmem [resolvable:$true] %s28_s28 }
   0x4   :  { %s256_s30 = smov 16  }
   0x5   :  { %34 = dma.hbm_to_vmem [thread:$0]  %s27_s26, 1024, %s29_s28, [#allocation3], %s255_s29, %s255_s29, %s256_s30  }
   0x6   :  { %248 = dma.done.wait [#allocation3], 1024  }
   0x7   :  { %249 = vsyncadd [#allocation3], 4294966272  ;;  %v257_v0 = vmov 0   ;;  %v43_v1 = vld [vmem:[%s326_s0] sm:$0xff]  ;;  %v68_v2 = vld [vmem:[#allocation2 + $0x30] sm:$0xff]  ;;  %vm76_vm0 = vcmask 261120  }
   0x8   :  { %173 = vset.pattern.permute.xlu0 %v257_v0  ;;  %v69_v3 = vld [vmem:[#allocation2 + $0x38] sm:$0xff]  ;;  %v164_v4 = vadd.f32 -99.5, %v43_v1  ;;  %92 = vmatpush.msra.mxu0 %v68_v2  ;;  %v66_v6 = vld [vmem:[#allocation2 + $0x20] sm:$0xff]  ;;  %v67_v7 = vld [vmem:[#allocation2 + $0x28] sm:$0xff]  ;;  %s258_s12 = smov [#allocation5]   ;;  %s138_s16 = sshll.u32 %s332_s6, 4  ;;  %s139_s16 = int_to_ptr.hbm [resolvable:$true] %s138_s16 }
   0x9   :  { %112 = vmatpush.msra.mxu1 %v69_v3  ;;  %v64_v8 = vld [vmem:[#allocation2 + $0x10] sm:$0xff]  ;;  %v65_v9 = vld [vmem:[#allocation2 + $0x18] sm:$0xff]  ;;  %v62_v10 = vld [vmem:[#allocation2] sm:$0xff]  ;;  %s136_s13 = sshll.u32 %s258_s12, 4  ;;  %vm121_vm1 = vcmask 588800   ;;  %s259_s6 = smov [#allocation6]   ;;  %s137_s13 = int_to_ptr.vmem [resolvable:$true] %s136_s13 }
   0xa   :  { %v45_v5 = vmul.f32 0.010050251, %v164_v4  ;;  %93 = vmatpush.msra.mxu0 %v66_v6  ;;  %v63_v11 = vld [vmem:[#allocation2 + $0x8] sm:$0xff]  ;;  %v174_v12 = vld [vmem:[%s327_s1] ss:$0 sm:$0xff]  ;;  %s147_s19 = sshll.u32 %s259_s6, 4  ;;  %s148_s19 = int_to_ptr.vmem [resolvable:$true] %s147_s19 }
   0xb   :  { %113 = vmatpush.msra.mxu1 %v67_v7  ;;  %v175_v13 = vld [vmem:[%s328_s2] ss:$0 sm:$0xff] }
   0xc   :  { %49 = vperm.xlu0 %173, %v45_v5   ;;  %94 = vmatpush.msra.mxu0 %v64_v8  ;;  %v123_v18 = vld [vmem:[%s331_s5] sm:$0x3]  ;;  %s149_s5 = sshll.u32 %s333_s7, 4  ;;  %s150_s5 = int_to_ptr.hbm [resolvable:$true] %s149_s5 }
   0xd   :  { %114 = vmatpush.msra.mxu1 %v65_v9  ;;  %v125_v19 = vperm.slane %v123_v18, 0  ;;  %v126_v20 = vperm.slane %v123_v18, 1  ;;  %v70_v21 = vld [vmem:[%s330_s4] sm:$0x3] }
   0xe   :  { %95 = vmatpush.msra.mxu0 %v62_v10  ;;  %v72_v22 = vperm.slane %v70_v21, 0  ;;  %v73_v23 = vperm.slane %v70_v21, 1 }
   0xf   :  { %115 = vmatpush.msra.mxu1 %v63_v11  ;;  %129 = vst [vmem:[#allocation5] sm:$0xff] %v125_v19 }
  0x10   :  { %130 = vst.msk [vmem:[#allocation5 + $0x8] sm:$0xff] %vm121_vm1, %v126_v20 }
  0x11   :  { %141 = dma.vmem_to_hbm [thread:$0]  %s137_s13, 256, %s139_s16, [#allocation4]  }
  0x7e   :  { %v50_v14 = vpop.permute.xlu0 %49 }
  0x7f   :  { %v55_v15 = vmul.f32 %v174_v12, %v50_v14 }
  0x81   :  { %v60_v16 = vadd.f32 %v175_v13, %v55_v15 }
  0x83   :  { %v61_v17 = vmax.f32 %v60_v16, 0.0 }
  0x85   :  { %165 = vmatmul.msk.f32.vlgmr.msra.gmra.mxu0 %vm76_vm0, %v61_v17  ;;  %166 = vmatmul.msk.f32.vlgmr.msra.gmra.mxu1 %vm76_vm0, %v61_v17 }
 0x102   :  { %v97_v24 = vpop.f32.mrf.mxu0  ;;  %v117_v25 = vpop.f32.mrf.mxu1 }
 0x103   :  { %v98_v26 = vadd.f32 %v97_v24, %v72_v22  ;;  %v118_v27 = vadd.f32 %v117_v25, %v73_v23 }
 0x105   :  { %120 = vst [vmem:[#allocation6] sm:$0xff] %v98_v26 }
 0x106   :  { %122 = vst.msk [vmem:[#allocation6 + $0x8] sm:$0xff] %vm121_vm1, %v118_v27 }
 0x107   :  { %152 = dma.vmem_to_hbm [thread:$0]  %s148_s19, 256, %s150_s5, [#allocation7]  }
 0x108   :  { %250 = dma.done.wait [#allocation4], 256  }
 0x109   :  { %251 = vsyncadd [#allocation4], 4294967040 }
 0x10a   :  { %252 = dma.done.wait [#allocation7], 256  }
 0x10b   :  { %253 = vsyncadd [#allocation7], 4294967040 }
 0x10c   :  { %161 = vsyncpa [#allocation3], 1 }
 0x10d   :  { %162 = vsyncpa [#allocation4], 1 }
 0x10e   :  { %163 = vsyncpa [#allocation7], 1 }

</bundles_post_ra>
